<compile_context>
chip_gen: v7x
topology: tpu7x:2x2x1
jax: 0.10.0
libtpu: 0.0.40
codegen_flags: <defaults>
</compile_context>

<pallas_src>
import jax
import jax.numpy as jnp
from jax.experimental import pallas as pl
from jax.experimental.pallas import tpu as pltpu

EPS = 1e-5
NEG_SLOPE = 0.01
LANE = 128
SUBLANE = 8


def _round_up(x, m):
    return (x + m - 1) // m * m


def _leaky_relu(x):
    return jnp.where(x > 0, x, NEG_SLOPE * x)


def _layernorm_mxu(h, gamma, beta):
    """Two-pass LayerNorm with the row reductions done on the MXU.

    Row sums are tiny matmuls against a resident ones(F, 8) constant (take
    column 0), keeping the XLU free; moments/rsqrt stay in f32.
    """
    f = h.shape[-1]
    ones = jnp.ones((f, 8), jnp.float32)
    inv_f = 1.0 / f
    mu = jnp.dot(h, ones, preferred_element_type=jnp.float32)[:, 0:1] * inv_f
    d = h - mu
    var = jnp.dot(d * d, ones, preferred_element_type=jnp.float32)[:, 0:1] * inv_f
    return d * jax.lax.rsqrt(var + EPS) * gamma + beta


def actor_kernel(x_ref, w1_ref, p1_ref, w2_ref, p2_ref, w3_ref, b3_ref, o_ref):
    # p*_ref rows: 0 = bias, 1 = gamma, 2 = beta (all f32).
    x = x_ref[...]

    # full1 -> layernorm1 -> leaky_relu
    w1 = w1_ref[...]
    h = jnp.dot(x.astype(w1.dtype), w1, preferred_element_type=jnp.float32)
    h = h + p1_ref[0:1, :]
    h = _leaky_relu(_layernorm_mxu(h, p1_ref[1:2, :], p1_ref[2:3, :]))

    # full2 -> layernorm2 -> leaky_relu
    w2 = w2_ref[...]
    h = jnp.dot(h.astype(w2.dtype), w2, preferred_element_type=jnp.float32)
    h = h + p2_ref[0:1, :]
    h = _leaky_relu(_layernorm_mxu(h, p2_ref[1:2, :], p2_ref[2:3, :]))

    # final -> tanh; narrow (nActions-wide) store, no lane padding.
    w3 = w3_ref[...]
    y = jnp.dot(h.astype(w3.dtype), w3, preferred_element_type=jnp.float32)
    y = y + b3_ref[...]
    o_ref[...] = jnp.tanh(y).astype(o_ref.dtype)


def actor_forward(x, params, *, block_batch=2048, matmul_dtype=jnp.bfloat16):
    """x: (B, stateDim) float32 (or bf16).  params: dict from init_params.

    block_batch: batch tile size (rounded to a multiple of 8 sublanes).
    matmul_dtype: jnp.bfloat16 (default, bf16 MXU operands + f32 accumulation)
                  or None (pure f32 MXU path).
    """
    B, S = x.shape
    F1 = params["w1"].shape[1]
    F2 = params["w2"].shape[1]
    nA = params["w3"].shape[1]

    w1, w2, w3 = params["w1"], params["w2"], params["w3"]
    if matmul_dtype is not None:
        w1 = w1.astype(matmul_dtype)
        w2 = w2.astype(matmul_dtype)
        w3 = w3.astype(matmul_dtype)
    b3 = params["b3"]  # (1, nA) f32, added in f32 after the MXU accumulate.
    # Pack per-layer (bias, gamma, beta) into one resident (3, F) array each.
    p1 = jnp.concatenate([params["b1"], params["g1"], params["be1"]], axis=0)
    p2 = jnp.concatenate([params["b2"], params["g2"], params["be2"]], axis=0)

    # Batch tiling: multiple of 8 sublanes.  For batches that would fit one
    # tile, split into two grid steps so both v7x TensorCores get work.
    tb = max(SUBLANE, min(_round_up(block_batch, SUBLANE), _round_up(B, SUBLANE)))
    if _round_up(B, SUBLANE) <= tb and B > 2 * SUBLANE:
        tb = _round_up(pl.cdiv(B, 2), SUBLANE)
    bp = _round_up(B, tb)
    if bp != B:
        x = jnp.pad(x, ((0, bp - B), (0, 0)))
    grid = (bp // tb,)

    const = lambda i: (0, 0)

    # VMEM budget with dims rounded to 128 lanes (actual VMEM footprint):
    # resident weights + double-buffered x/out tiles + live f32 activations.
    S_l, F1_l, F2_l, nA_l = (_round_up(d, LANE) for d in (S, F1, F2, nA))
    w_item = jnp.dtype(w1.dtype).itemsize
    x_item = jnp.dtype(x.dtype).itemsize
    weight_vmem = (S_l * F1_l + F1_l * F2_l + F2_l * nA_l) * w_item \
        + (SUBLANE * F1_l + SUBLANE * F2_l + SUBLANE * nA_l) * 4
    stream_vmem = 2 * tb * (S_l * x_item + nA_l * 4)
    act_vmem = 4 * tb * max(F1_l, F2_l) * 4
    vmem_limit = int(1.5 * (weight_vmem + stream_vmem + act_vmem)) + (4 << 20)
    vmem_limit = max(16 << 20, min(vmem_limit, 48 << 20))  # <=48 MiB: v7x headroom

    weight_hbm = (S * F1 + F1 * F2 + F2 * nA) * w_item + (3 * F1 + 3 * F2 + nA) * 4
    cost = pl.CostEstimate(
        flops=2 * bp * (S * F1 + F1 * F2 + F2 * nA + 16 * (F1 + F2)),
        transcendentals=bp * (nA + 2),          # tanh per action + 2 rsqrt per row
        bytes_accessed=bp * (S * x_item + nA * 4) + weight_hbm,
    )

    out = pl.pallas_call(
        actor_kernel,
        out_shape=jax.ShapeDtypeStruct((bp, nA), jnp.float32),
        grid=grid,
        in_specs=[
            pl.BlockSpec((tb, S), lambda i: (i, 0)),   # streamed activations
            pl.BlockSpec((S, F1), const),              # resident weights/params
            pl.BlockSpec((3, F1), const),
            pl.BlockSpec((F1, F2), const),
            pl.BlockSpec((3, F2), const),
            pl.BlockSpec((F2, nA), const),
            pl.BlockSpec((1, nA), const),
        ],
        out_specs=pl.BlockSpec((tb, nA), lambda i: (i, 0)),
        compiler_params=pltpu.CompilerParams(
            dimension_semantics=("parallel",),
            vmem_limit_bytes=vmem_limit,
        ),
        cost_estimate=cost,
    )(x, w1, p1, w2, p2, w3, b3)
    return out[:B]


def _kaiming_uniform(key, fan_in, shape, a=0.01):
    # nn.init.kaiming_uniform_(a=0.01, mode='fan_in', nonlinearity='leaky_relu')
    gain = (2.0 / (1.0 + a * a)) ** 0.5
    bound = gain * (3.0 / fan_in) ** 0.5
    return jax.random.uniform(key, shape, jnp.float32, -bound, bound)


def init_params(key, stateDim, full1Dim, full2Dim, nActions):
    ks = jax.random.split(key, 6)
    w1 = _kaiming_uniform(ks[0], stateDim, (stateDim, full1Dim))
    w2 = _kaiming_uniform(ks[1], full1Dim, (full1Dim, full2Dim))
    fb = 1.0 / (full2Dim ** 0.5)
    w3 = jax.random.uniform(ks[2], (full2Dim, nActions), jnp.float32, -fb, fb)
    b1 = jax.random.uniform(ks[3], (1, full1Dim), jnp.float32,
                            -1.0 / stateDim ** 0.5, 1.0 / stateDim ** 0.5)
    b2 = jax.random.uniform(ks[4], (1, full2Dim), jnp.float32,
                            -1.0 / full1Dim ** 0.5, 1.0 / full1Dim ** 0.5)
    b3 = jax.random.uniform(ks[5], (1, nActions), jnp.float32, -fb, fb)
    return {
        "w1": w1, "b1": b1,
        "g1": jnp.ones((1, full1Dim), jnp.float32),
        "be1": jnp.zeros((1, full1Dim), jnp.float32),
        "w2": w2, "b2": b2,
        "g2": jnp.ones((1, full2Dim), jnp.float32),
        "be2": jnp.zeros((1, full2Dim), jnp.float32),
        "w3": w3, "b3": b3,
    }


def actor_reference(x, p):
    """Pure-JAX reference (two-pass LN) for correctness checking."""
    def ln(h, g, b):
        mu = jnp.mean(h, axis=-1, keepdims=True)
        var = jnp.mean((h - mu) ** 2, axis=-1, keepdims=True)
        return (h - mu) * jax.lax.rsqrt(var + EPS) * g + b
    h = x @ p["w1"] + p["b1"]
    h = _leaky_relu(ln(h, p["g1"], p["be1"]))
    h = h @ p["w2"] + p["b2"]
    h = _leaky_relu(ln(h, p["g2"], p["be2"]))
    return jnp.tanh(h @ p["w3"] + p["b3"])


if __name__ == "__main__":
    stateDim, full1Dim, full2Dim, nActions = 32, 128, 128, 8
    batch = 8

    key = jax.random.PRNGKey(0)
    kx, kp = jax.random.split(key)
    x = jax.random.normal(kx, (batch, stateDim), jnp.float32)
    params = init_params(kp, stateDim, full1Dim, full2Dim, nActions)

    y_ref = actor_reference(x, params)

    # Default bf16-operand MXU path (f32 accumulation) — primary path.
    y_bf16 = jax.block_until_ready(actor_forward(x, params))
    assert y_bf16.shape == (batch, nActions)
    assert jnp.allclose(y_bf16, y_ref, atol=5e-2, rtol=5e-2), "bf16 kernel mismatch"

    # Pure-f32 MXU path — tighter check.
    y_f32 = jax.block_until_ready(actor_forward(x, params, matmul_dtype=None))
    assert y_f32.shape == (batch, nActions)
    assert jnp.allclose(y_f32, y_ref, atol=1e-3, rtol=1e-3), "f32 kernel mismatch"

    print("KERNEL_OK")
</pallas_src>

<mosaic_0001>
module attributes {stable_mosaic.version = 11 : i64} {
  func.func @actor_kernel(%arg0: i32, %arg1: memref<8x32xf32, #tpu.memory_space<vmem>>, %arg2: memref<32x128xbf16, #tpu.memory_space<vmem>>, %arg3: memref<3x128xf32, #tpu.memory_space<vmem>>, %arg4: memref<128x128xbf16, #tpu.memory_space<vmem>>, %arg5: memref<3x128xf32, #tpu.memory_space<vmem>>, %arg6: memref<128x8xbf16, #tpu.memory_space<vmem>>, %arg7: memref<1x8xf32, #tpu.memory_space<vmem>>, %arg8: memref<8x8xf32, #tpu.memory_space<vmem>>) attributes {dimension_semantics = [#tpu.dimension_semantics<parallel>], iteration_bounds = array<i64: 1>, scalar_prefetch = 0 : i64, scratch_operands = 0 : i64, tpu.core_type = #tpu.core_type<tc>, window_params = [{transform_indices = @transform_0, window_bounds = array<i64: 8, 32>}, {pipeline_mode = #tpu.pipeline_mode<synchronous>, transform_indices = @transform_1, window_bounds = array<i64: 32, 128>}, {pipeline_mode = #tpu.pipeline_mode<synchronous>, transform_indices = @transform_2, window_bounds = array<i64: 3, 128>}, {pipeline_mode = #tpu.pipeline_mode<synchronous>, transform_indices = @transform_3, window_bounds = array<i64: 128, 128>}, {pipeline_mode = #tpu.pipeline_mode<synchronous>, transform_indices = @transform_4, window_bounds = array<i64: 3, 128>}, {pipeline_mode = #tpu.pipeline_mode<synchronous>, transform_indices = @transform_5, window_bounds = array<i64: 128, 8>}, {pipeline_mode = #tpu.pipeline_mode<synchronous>, transform_indices = @transform_6, window_bounds = array<i64: 1, 8>}, {transform_indices = @transform_7, window_bounds = array<i64: 8, 8>}]} {
    %c0 = arith.constant 0 : index
    %c0_0 = arith.constant 0 : index
    %0 = vector.load %arg1[%c0, %c0_0] : memref<8x32xf32, #tpu.memory_space<vmem>>, vector<8x32xf32>
    %c0_1 = arith.constant 0 : index
    %c0_2 = arith.constant 0 : index
    %1 = vector.load %arg2[%c0_1, %c0_2] : memref<32x128xbf16, #tpu.memory_space<vmem>>, vector<32x128xbf16>
    %2 = arith.truncf %0 : vector<8x32xf32> to vector<8x32xbf16>
    %cst = arith.constant dense<0.000000e+00> : vector<8x128xf32>
    %3 = tpu.matmul %2, %1, %cst {dimension_numbers = #tpu.dot_dimension_numbers<[1], [0], [0], [1], [0, 0, 1, 1], [], []>} : vector<8x32xbf16>, vector<32x128xbf16>, vector<8x128xf32> -> vector<8x128xf32>
    %c0_3 = arith.constant 0 : index
    %c0_4 = arith.constant 0 : index
    %4 = vector.load %arg3[%c0_3, %c0_4] : memref<3x128xf32, #tpu.memory_space<vmem>>, vector<1x128xf32>
    %5 = vector.broadcast %4 : vector<1x128xf32> to vector<8x128xf32>
    %6 = arith.addf %3, %5 : vector<8x128xf32>
    %c1 = arith.constant 1 : index
    %c0_5 = arith.constant 0 : index
    %7 = vector.load %arg3[%c1, %c0_5] : memref<3x128xf32, #tpu.memory_space<vmem>>, vector<1x128xf32>
    %c2 = arith.constant 2 : index
    %c0_6 = arith.constant 0 : index
    %8 = vector.load %arg3[%c2, %c0_6] : memref<3x128xf32, #tpu.memory_space<vmem>>, vector<1x128xf32>
    %cst_7 = arith.constant 1.000000e+00 : f32
    %9 = vector.broadcast %cst_7 : f32 to vector<128x8xf32>
    %cst_8 = arith.constant dense<0.000000e+00> : vector<8x8xf32>
    %10 = tpu.matmul %6, %9, %cst_8 {dimension_numbers = #tpu.dot_dimension_numbers<[1], [0], [0], [1], [0, 0, 1, 1], [], []>} : vector<8x128xf32>, vector<128x8xf32>, vector<8x8xf32> -> vector<8x8xf32>
    %11 = vector.extract_strided_slice %10 {offsets = [0, 0], sizes = [8, 1], strides = [1, 1]} : vector<8x8xf32> to vector<8x1xf32>
    %cst_9 = arith.constant 7.812500e-03 : f32
    %12 = vector.broadcast %cst_9 : f32 to vector<8x1xf32>
    %13 = arith.mulf %11, %12 : vector<8x1xf32>
    %14 = vector.broadcast %13 : vector<8x1xf32> to vector<8x128xf32>
    %15 = arith.subf %6, %14 : vector<8x128xf32>
    %16 = arith.mulf %15, %15 : vector<8x128xf32>
    %cst_10 = arith.constant dense<0.000000e+00> : vector<8x8xf32>
    %17 = tpu.matmul %16, %9, %cst_10 {dimension_numbers = #tpu.dot_dimension_numbers<[1], [0], [0], [1], [0, 0, 1, 1], [], []>} : vector<8x128xf32>, vector<128x8xf32>, vector<8x8xf32> -> vector<8x8xf32>
    %18 = vector.extract_strided_slice %17 {offsets = [0, 0], sizes = [8, 1], strides = [1, 1]} : vector<8x8xf32> to vector<8x1xf32>
    %cst_11 = arith.constant 7.812500e-03 : f32
    %19 = vector.broadcast %cst_11 : f32 to vector<8x1xf32>
    %20 = arith.mulf %18, %19 : vector<8x1xf32>
    %cst_12 = arith.constant 9.99999974E-6 : f32
    %21 = vector.broadcast %cst_12 : f32 to vector<8x1xf32>
    %22 = arith.addf %20, %21 : vector<8x1xf32>
    %23 = math.rsqrt %22 : vector<8x1xf32>
    %24 = vector.broadcast %23 : vector<8x1xf32> to vector<8x128xf32>
    %25 = arith.mulf %15, %24 : vector<8x128xf32>
    %26 = vector.broadcast %7 : vector<1x128xf32> to vector<8x128xf32>
    %27 = arith.mulf %25, %26 : vector<8x128xf32>
    %28 = vector.broadcast %8 : vector<1x128xf32> to vector<8x128xf32>
    %29 = arith.addf %27, %28 : vector<8x128xf32>
    %cst_13 = arith.constant 0.000000e+00 : f32
    %30 = vector.broadcast %cst_13 : f32 to vector<8x128xf32>
    %31 = arith.cmpf ogt, %29, %30 : vector<8x128xf32>
    %cst_14 = arith.constant 0.00999999977 : f32
    %32 = vector.broadcast %cst_14 : f32 to vector<8x128xf32>
    %33 = arith.mulf %32, %29 : vector<8x128xf32>
    %34 = arith.select %31, %29, %33 : vector<8x128xi1>, vector<8x128xf32>
    %c0_15 = arith.constant 0 : index
    %c0_16 = arith.constant 0 : index
    %35 = vector.load %arg4[%c0_15, %c0_16] : memref<128x128xbf16, #tpu.memory_space<vmem>>, vector<128x128xbf16>
    %36 = arith.truncf %34 : vector<8x128xf32> to vector<8x128xbf16>
    %cst_17 = arith.constant dense<0.000000e+00> : vector<8x128xf32>
    %37 = tpu.matmul %36, %35, %cst_17 {dimension_numbers = #tpu.dot_dimension_numbers<[1], [0], [0], [1], [0, 0, 1, 1], [], []>} : vector<8x128xbf16>, vector<128x128xbf16>, vector<8x128xf32> -> vector<8x128xf32>
    %c0_18 = arith.constant 0 : index
    %c0_19 = arith.constant 0 : index
    %38 = vector.load %arg5[%c0_18, %c0_19] : memref<3x128xf32, #tpu.memory_space<vmem>>, vector<1x128xf32>
    %39 = vector.broadcast %38 : vector<1x128xf32> to vector<8x128xf32>
    %40 = arith.addf %37, %39 : vector<8x128xf32>
    %c1_20 = arith.constant 1 : index
    %c0_21 = arith.constant 0 : index
    %41 = vector.load %arg5[%c1_20, %c0_21] : memref<3x128xf32, #tpu.memory_space<vmem>>, vector<1x128xf32>
    %c2_22 = arith.constant 2 : index
    %c0_23 = arith.constant 0 : index
    %42 = vector.load %arg5[%c2_22, %c0_23] : memref<3x128xf32, #tpu.memory_space<vmem>>, vector<1x128xf32>
    %cst_24 = arith.constant 1.000000e+00 : f32
    %43 = vector.broadcast %cst_24 : f32 to vector<128x8xf32>
    %cst_25 = arith.constant dense<0.000000e+00> : vector<8x8xf32>
    %44 = tpu.matmul %40, %43, %cst_25 {dimension_numbers = #tpu.dot_dimension_numbers<[1], [0], [0], [1], [0, 0, 1, 1], [], []>} : vector<8x128xf32>, vector<128x8xf32>, vector<8x8xf32> -> vector<8x8xf32>
    %45 = vector.extract_strided_slice %44 {offsets = [0, 0], sizes = [8, 1], strides = [1, 1]} : vector<8x8xf32> to vector<8x1xf32>
    %cst_26 = arith.constant 7.812500e-03 : f32
    %46 = vector.broadcast %cst_26 : f32 to vector<8x1xf32>
    %47 = arith.mulf %45, %46 : vector<8x1xf32>
    %48 = vector.broadcast %47 : vector<8x1xf32> to vector<8x128xf32>
    %49 = arith.subf %40, %48 : vector<8x128xf32>
    %50 = arith.mulf %49, %49 : vector<8x128xf32>
    %cst_27 = arith.constant dense<0.000000e+00> : vector<8x8xf32>
    %51 = tpu.matmul %50, %43, %cst_27 {dimension_numbers = #tpu.dot_dimension_numbers<[1], [0], [0], [1], [0, 0, 1, 1], [], []>} : vector<8x128xf32>, vector<128x8xf32>, vector<8x8xf32> -> vector<8x8xf32>
    %52 = vector.extract_strided_slice %51 {offsets = [0, 0], sizes = [8, 1], strides = [1, 1]} : vector<8x8xf32> to vector<8x1xf32>
    %cst_28 = arith.constant 7.812500e-03 : f32
    %53 = vector.broadcast %cst_28 : f32 to vector<8x1xf32>
    %54 = arith.mulf %52, %53 : vector<8x1xf32>
    %cst_29 = arith.constant 9.99999974E-6 : f32
    %55 = vector.broadcast %cst_29 : f32 to vector<8x1xf32>
    %56 = arith.addf %54, %55 : vector<8x1xf32>
    %57 = math.rsqrt %56 : vector<8x1xf32>
    %58 = vector.broadcast %57 : vector<8x1xf32> to vector<8x128xf32>
    %59 = arith.mulf %49, %58 : vector<8x128xf32>
    %60 = vector.broadcast %41 : vector<1x128xf32> to vector<8x128xf32>
    %61 = arith.mulf %59, %60 : vector<8x128xf32>
    %62 = vector.broadcast %42 : vector<1x128xf32> to vector<8x128xf32>
    %63 = arith.addf %61, %62 : vector<8x128xf32>
    %cst_30 = arith.constant 0.000000e+00 : f32
    %64 = vector.broadcast %cst_30 : f32 to vector<8x128xf32>
    %65 = arith.cmpf ogt, %63, %64 : vector<8x128xf32>
    %cst_31 = arith.constant 0.00999999977 : f32
    %66 = vector.broadcast %cst_31 : f32 to vector<8x128xf32>
    %67 = arith.mulf %66, %63 : vector<8x128xf32>
    %68 = arith.select %65, %63, %67 : vector<8x128xi1>, vector<8x128xf32>
    %c0_32 = arith.constant 0 : index
    %c0_33 = arith.constant 0 : index
    %69 = vector.load %arg6[%c0_32, %c0_33] : memref<128x8xbf16, #tpu.memory_space<vmem>>, vector<128x8xbf16>
    %70 = arith.truncf %68 : vector<8x128xf32> to vector<8x128xbf16>
    %cst_34 = arith.constant dense<0.000000e+00> : vector<8x8xf32>
    %71 = tpu.matmul %70, %69, %cst_34 {dimension_numbers = #tpu.dot_dimension_numbers<[1], [0], [0], [1], [0, 0, 1, 1], [], []>} : vector<8x128xbf16>, vector<128x8xbf16>, vector<8x8xf32> -> vector<8x8xf32>
    %c0_35 = arith.constant 0 : index
    %c0_36 = arith.constant 0 : index
    %72 = vector.load %arg7[%c0_35, %c0_36] : memref<1x8xf32, #tpu.memory_space<vmem>>, vector<1x8xf32>
    %73 = vector.broadcast %72 : vector<1x8xf32> to vector<8x8xf32>
    %74 = arith.addf %71, %73 : vector<8x8xf32>
    %75 = math.tanh %74 : vector<8x8xf32>
    %c0_37 = arith.constant 0 : index
    %c0_38 = arith.constant 0 : index
    %76 = vector.load %arg8[%c0_37, %c0_38] : memref<8x8xf32, #tpu.memory_space<vmem>>, vector<8x8xf32>
    tpu.vector_store %arg8[%c0_37, %c0_38], %75 {strides = array<i32>} : memref<8x8xf32, #tpu.memory_space<vmem>>, vector<8x8xf32>,
    return
  }
  func.func @transform_0(%arg0: i32) -> (i32, i32) {
    %c0_i32 = arith.constant 0 : i32
    %c0_i32_0 = arith.constant 0 : i32
    return %arg0, %c0_i32 : i32, i32
  }
  func.func @transform_1(%arg0: i32) -> (i32, i32) {
    %c0_i32 = arith.constant 0 : i32
    %c0_i32_0 = arith.constant 0 : i32
    %c0_i32_1 = arith.constant 0 : i32
    return %c0_i32, %c0_i32_0 : i32, i32
  }
  func.func @transform_2(%arg0: i32) -> (i32, i32) {
    %c0_i32 = arith.constant 0 : i32
    %c0_i32_0 = arith.constant 0 : i32
    %c0_i32_1 = arith.constant 0 : i32
    return %c0_i32, %c0_i32_0 : i32, i32
  }
  func.func @transform_3(%arg0: i32) -> (i32, i32) {
    %c0_i32 = arith.constant 0 : i32
    %c0_i32_0 = arith.constant 0 : i32
    %c0_i32_1 = arith.constant 0 : i32
    return %c0_i32, %c0_i32_0 : i32, i32
  }
  func.func @transform_4(%arg0: i32) -> (i32, i32) {
    %c0_i32 = arith.constant 0 : i32
    %c0_i32_0 = arith.constant 0 : i32
    %c0_i32_1 = arith.constant 0 : i32
    return %c0_i32, %c0_i32_0 : i32, i32
  }
  func.func @transform_5(%arg0: i32) -> (i32, i32) {
    %c0_i32 = arith.constant 0 : i32
    %c0_i32_0 = arith.constant 0 : i32
    %c0_i32_1 = arith.constant 0 : i32
    return %c0_i32, %c0_i32_0 : i32, i32
  }
  func.func @transform_6(%arg0: i32) -> (i32, i32) {
    %c0_i32 = arith.constant 0 : i32
    %c0_i32_0 = arith.constant 0 : i32
    %c0_i32_1 = arith.constant 0 : i32
    return %c0_i32, %c0_i32_0 : i32, i32
  }
  func.func @transform_7(%arg0: i32) -> (i32, i32) {
    %c0_i32 = arith.constant 0 : i32
    %c0_i32_0 = arith.constant 0 : i32
    return %arg0, %c0_i32 : i32, i32
  }
}

</mosaic_0001>

<bundles_post_ra>
// kernel: tpu_custom_call.1
= control target key start
LH: loop header
LB: loop body
LE: loop exit
PB: predicated region body
PF: predicated region fallthrough
CT: control target
= control target key end

     0   :  { %12 = vsyncpa [#allocation3], 0  ;;  %s1426_s0 = inlined_call_operand.vmem [shape: f32[8,32], index: 0, kind: input, shape index: {}]   ;;  %s1427_s1 = inlined_call_operand.hbm [shape: bf16[32,128], index: 1, kind: input, shape index: {}]   ;;  %s1428_s2 = inlined_call_operand.vmem [shape: f32[3,128], index: 2, kind: input, shape index: {}]   ;;  %s1429_s3 = inlined_call_operand.vmem [shape: bf16[128,128], index: 3, kind: input, shape index: {}]   ;;  %s1430_s4 = inlined_call_operand.hbm [shape: f32[3,128], index: 4, kind: input, shape index: {}]   ;;  %s1431_s5 = inlined_call_operand.vmem [shape: bf16[128,8], index: 5, kind: input, shape index: {}]   ;;  %s1432_s6 = inlined_call_operand.vmem [shape: f32[1,8], index: 6, kind: input, shape index: {}]   ;;  %s1433_s7 = inlined_call_operand.hbm [shape: f32[8,8], index: 7, kind: output, shape index: {}]  }
   0x1   :  { %13 = vsyncpa [#allocation6], 0 }
   0x2   :  { %14 = vsyncpa [#allocation4], 0  ;;  %s1181_s24 = smov [#allocation2]   ;;  %s1109_s28 = scalar_lea.hbm %s1427_s1, 256 }
   0x3   :  { %s22_s25 = sshll.u32 %s1181_s24, 4  ;;  %p1110_p0 = scmp.ne.s32.totalorder %s1427_s1, %s1109_s28  ;;  %s23_s25 = int_to_ptr.vmem [resolvable:$true] %s22_s25 }
   0x4   :  { %p1113_p1 = scmp.lt.u32.totalorder %s1109_s28, %s1427_s1 }
   0x6   :  { %p1115_p2 = pnand %p1113_p1, %p1110_p0 }
   0x8   :  { %1118 = shalt.err (!%p1115_p2)
}
   0x9   :  { %s1119_s10 = scalar_lea.vmem %s23_s25, 256  ;;  %p1124_p4 = scmp.lt.s32.totalorder %s23_s25, %s23_s25 }
   0xa   :  { %p1120_p3 = scmp.ne.s32.totalorder %s23_s25, %s1119_s10  ;;  %p1125_p5 = scmp.lt.s32.totalorder %s1119_s10, %s1119_s10 }
   0xc   :  { %p1126_p6 = por %p1125_p5, %p1124_p4 }
   0xe   :  { %p1127_p7 = pnand %p1126_p6, %p1120_p3 }
  0x10   :  { %1130 = shalt.err (!%p1127_p7)
}
  0x11   :  { %s1182_s11 = smov 64   ;;  %s1183_s12 = smov 4  }
  0x12   :  { %28 = dma.hbm_to_vmem [thread:$0]  %s1427_s1, 256, %s23_s25, [#allocation3], %s1182_s11, %s1182_s11, %s1183_s12  }
  0x13   :  { %s1184_s15 = smov [#allocation5]   ;;  %s1131_s19 = scalar_lea.hbm %s1430_s4, 64 }
  0x14   :  { %s39_s16 = sshll.u32 %s1184_s15, 4  ;;  %p1132_p8 = scmp.ne.s32.totalorder %s1430_s4, %s1131_s19  ;;  %s40_s16 = int_to_ptr.vmem [resolvable:$true] %s39_s16 }
  0x15   :  { %p1135_p9 = scmp.lt.u32.totalorder %s1131_s19, %s1430_s4 }
  0x17   :  { %p1137_p10 = pnand %p1135_p9, %p1132_p8 }
  0x19   :  { %1140 = shalt.err (!%p1137_p10)
}
  0x1a   :  { %s1141_s24 = scalar_lea.vmem %s40_s16, 64  ;;  %p1146_p12 = scmp.lt.s32.totalorder %s40_s16, %s40_s16 }
  0x1b   :  { %p1142_p11 = scmp.ne.s32.totalorder %s40_s16, %s1141_s24  ;;  %p1147_p13 = scmp.lt.s32.totalorder %s1141_s24, %s1141_s24 }
  0x1d   :  { %p1148_p0 = por %p1147_p13, %p1146_p12 }
  0x1f   :  { %p1149_p1 = pnand %p1148_p0, %p1142_p11 }
  0x21   :  { %1152 = shalt.err (!%p1149_p1)
}
  0x22   :  { %42 = dma.hbm_to_vmem [thread:$0]  %s1430_s4, 64, %s40_s16, [#allocation6]  }
  0x23   :  { %1175 = dma.done.wait [#allocation3], 256  }
  0x24   :  { %1176 = vsyncadd [#allocation3], 4294967040 }
  0x25   :  { %1177 = dma.done.wait [#allocation6], 64  }
  0x26   :  { %1178 = vsyncadd [#allocation6], 4294967232  ;;  %v1185_v0 = vmov 0.0   ;;  %vm1186_vm0 = vmmov 0   ;;  %v1187_v1 = vmov 0.0|0.0   ;;  %v1085_v3 = vld [vmem:[#allocation2] sm:$0xff]  }
  0x27   :  { %821 = vmatprep.subr.bf16.mxu1 %v1185_v0  ;;  %825 = vmatprep.mubr.msk.bf16.mxu1 %vm1186_vm0, %v1185_v0  ;;  %v1188_v2 = vmov 1.0|1.0   ;;  %v1086_v4 = vld [vmem:[#allocation2 + $0x8] sm:$0xff]   ;;  %v54_v5 = vld [vmem:[%s1426_s0] sm:$0xff]  ;;  %vm77_vm1 = vcmask 261120   ;;  %v1189_v13 = vmov 0  }
  0x28   :  { %1025 = vmatprep.subr.bf16.mxu0 %v1187_v1  ;;  %896 = vmatprep.mubr.msk.f32.mxu0 %vm1186_vm0, %v1185_v0  ;;  %v59_v6 = vpack.c.bf16 %v54_v5, %v54_v5  ;;  %v706_v7 = vld [vmem:[%s1428_s2] ss:$0 sm:$0xff]  ;;  %v1088_v21 = vld [vmem:[%s1429_s3 + $0x8] sm:$0xff]   ;;  %v1089_v22 = vld [vmem:[%s1429_s3 + $0x10] sm:$0xff]   ;;  %vm688_vm4 = vcmask 64512  }
  0x29   :  { %1026 = vmatpush3.bf16.msra.mxu0 %v1188_v2  ;;  %822 = vmatpush3.bf16.msra.mxu1 %v1085_v3  ;;  %v1087_v20 = vld [vmem:[%s1429_s3] sm:$0xff]   ;;  %v1090_v23 = vld [vmem:[%s1429_s3 + $0x18] sm:$0xff]   ;;  %v1092_v29 = vld [vmem:[%s1429_s3 + $0x28] sm:$0xff]  }
  0x2a   :  { %1027 = vmatprep.subr.bf16.mxu0 %v1187_v1  ;;  %823 = vmatprep.subr.bf16.mxu1 %v1185_v0  ;;  %v1091_v24 = vld [vmem:[%s1429_s3 + $0x20] sm:$0xff]   ;;  %v1093_v31 = vld [vmem:[%s1429_s3 + $0x30] sm:$0xff]   ;;  %v1094_v32 = vld [vmem:[%s1429_s3 + $0x38] sm:$0xff]  }
  0x2b   :  { %1083 = vset.pattern.permute.xlu0 %v1189_v13  ;;  %1084 = vset.pattern.permute.xlu1 %v1189_v13  ;;  %v710_v33 = vld [vmem:[%s1428_s2 + $0x1] ss:$0 sm:$0xff]  ;;  %v711_v36 = vld [vmem:[%s1428_s2 + $0x2] ss:$0 sm:$0xff]  ;;  %v712_v42 = vld [vmem:[#allocation5] ss:$0 sm:$0xff] }
  0x2c   :  { %v1095_v54 = vld [vmem:[%s1431_s5] sm:$0xff]   ;;  %v1096_v55 = vld [vmem:[%s1431_s5 + $0x8] sm:$0xff]   ;;  %v1097_v56 = vld [vmem:[%s1431_s5 + $0x10] sm:$0xff]  }
  0x2d   :  { %1028 = vmatpush3.bf16.msra.mxu0 %v1188_v2  ;;  %824 = vmatpush3.bf16.msra.mxu1 %v1086_v4  ;;  %v1098_v57 = vld [vmem:[%s1431_s5 + $0x18] sm:$0xff]   ;;  %v1099_v58 = vld [vmem:[%s1431_s5 + $0x20] sm:$0xff]   ;;  %v1100_v63 = vld [vmem:[%s1431_s5 + $0x28] sm:$0xff]  }
  0x2e   :  { %1029 = vmatprep.subr.bf16.mxu0 %v1187_v1  ;;  %1009 = vmatprep.subr.bf16.mxu1 %v1187_v1  ;;  %v1102_v3 = vld [vmem:[%s1431_s5 + $0x38] sm:$0xff]   ;;  %v721_v4 = vld [vmem:[#allocation5 + $0x1] ss:$0 sm:$0xff] }
  0x30   :  { %826 = vmatmul.mubr.msk.bf16.vlgmr.msra.gmra.mrb[0].mxu1 %vm77_vm1, %v59_v6 }
  0x31   :  { %1030 = vmatpush3.bf16.msra.mxu0 %v1188_v2  ;;  %1010 = vmatpush3.bf16.msra.mxu1 %v1188_v2 }
  0x32   :  { %1031 = vmatprep.subr.bf16.mxu0 %v1187_v1  ;;  %861 = vmatprep.mubr.msk.f32.mxu1 %vm1186_vm0, %v1185_v0 }
  0x33   :  { %1011 = vmatprep.subr.bf16.mxu1 %v1187_v1 }
  0x35   :  { %1032 = vmatpush3.bf16.msra.mxu0 %v1188_v2  ;;  %1012 = vmatpush3.bf16.msra.mxu1 %v1188_v2 }
  0x36   :  { %1033 = vmatprep.subr.bf16.mxu0 %v1187_v1  ;;  %1013 = vmatprep.subr.bf16.mxu1 %v1187_v1 }
  0x39   :  { %1034 = vmatpush3.bf16.msra.mxu0 %v1188_v2  ;;  %1014 = vmatpush3.bf16.msra.mxu1 %v1188_v2 }
  0x3a   :  { %1035 = vmatprep.subr.bf16.mxu0 %v1187_v1  ;;  %1015 = vmatprep.subr.bf16.mxu1 %v1187_v1 }
  0x3d   :  { %1036 = vmatpush3.bf16.msra.mxu0 %v1188_v2  ;;  %1016 = vmatpush3.bf16.msra.mxu1 %v1188_v2 }
  0x3e   :  { %1037 = vmatprep.subr.bf16.mxu0 %v1187_v1  ;;  %1017 = vmatprep.subr.bf16.mxu1 %v1187_v1 }
  0x41   :  { %1038 = vmatpush3.bf16.msra.mxu0 %v1188_v2  ;;  %1018 = vmatpush3.bf16.msra.mxu1 %v1188_v2 }
  0x42   :  { %1039 = vmatprep.subr.bf16.mxu0 %v1187_v1  ;;  %1019 = vmatprep.subr.bf16.mxu1 %v1187_v1 }
  0x45   :  { %1040 = vmatpush3.bf16.msra.mxu0 %v1188_v2  ;;  %1020 = vmatpush3.bf16.msra.mxu1 %v1188_v2 }
  0x46   :  { %1041 = vmatprep.subr.bf16.mxu0 %v1187_v1  ;;  %1021 = vmatprep.subr.bf16.mxu1 %v1187_v1 }
  0x49   :  { %1022 = vmatpush3.bf16.msra.mxu1 %v1188_v2 }
  0x4a   :  { %1023 = vmatprep.subr.bf16.mxu1 %v1187_v1 }
  0x4d   :  { %1024 = vmatpush3.bf16.msra.mxu1 %v1188_v2 }
  0x4e   :  { %899 = vmatprep.subr.bf16.mxu1 %v1185_v0 }
 0x103   :  { %v115_v8 = vpop.f32.mrb[0].mxu1 }
 0x104   :  { %v116_v9 = vadd.f32 %v706_v7, %v115_v8  ;;  %v827_v10 = vpop.f32.mrb[1].mxu1  ;;  %v722_v7 = vld [vmem:[#allocation5 + $0x2] ss:$0 sm:$0xff] }
 0x105   :  { %v118_v11 = vpop.f32.mrb[2].mxu1 }
 0x106   :  { %v828_v12 = vpop.f32.mrb[3].mxu1  ;;  %862 = vmatmul.mubr.f32.vlgmr.msra.gmra.mrb[4].mxu1 %v116_v9 }
 0x107   :  { %915 = vmatprep.mubr.msk.bf16.mxu1 %vm1186_vm0, %v1185_v0  ;;  %900 = vmatpush3.bf16.msra.mxu1 %v1087_v20 }
 0x108   :  { %901 = vmatprep.subr.bf16.mxu1 %v1185_v0 }
 0x10b   :  { %902 = vmatpush3.bf16.msra.mxu1 %v1088_v21 }
 0x10c   :  { %903 = vmatprep.subr.bf16.mxu1 %v1185_v0 }
 0x10f   :  { %904 = vmatpush3.bf16.msra.mxu1 %v1089_v22 }
 0x110   :  { %905 = vmatprep.subr.bf16.mxu1 %v1185_v0 }
 0x113   :  { %906 = vmatpush3.bf16.msra.mxu1 %v1090_v23 }
 0x114   :  { %907 = vmatprep.subr.bf16.mxu1 %v1185_v0 }
 0x117   :  { %908 = vmatpush3.bf16.msra.mxu1 %v1091_v24 }
 0x118   :  { %909 = vmatprep.subr.bf16.mxu1 %v1185_v0 }
 0x11b   :  { %910 = vmatpush3.bf16.msra.mxu1 %v1092_v29 }
 0x11c   :  { %911 = vmatprep.subr.bf16.mxu1 %v1185_v0 }
 0x11f   :  { %912 = vmatpush3.bf16.msra.mxu1 %v1093_v31 }
 0x120   :  { %913 = vmatprep.subr.bf16.mxu1 %v1185_v0 }
 0x123   :  { %914 = vmatpush3.bf16.msra.mxu1 %v1094_v32 }
 0x124   :  { %1057 = vmatprep.subr.bf16.mxu1 %v1187_v1 }
 0x1d9   :  { %v189_v14 = vpop.f32.mrb[4].mxu1 }
 0x1da   :  { %v193_v15 = vmul.f32 0.0078125, %v189_v14  ;;  %v863_v16 = vpop.f32.mrb[5].mxu1 }
 0x1dc   :  { %196 = vperm.xlu0 %1083, %v193_v15  }
 0x25b   :  { %v197_v17 = vpop.permute.xlu0 %196 }
 0x25c   :  { %v199_v18 = vsub.f32 %v116_v9, %v197_v17 }
 0x25e   :  { %v200_v19 = vmul.f32 %v199_v18, %v199_v18 }
 0x260   :  { %897 = vmatmul.mubr.f32.vlgmr.msra.gmra.mrb[0].mxu0 %v200_v19 }
 0x261   :  { %1042 = vmatpush3.bf16.msra.mxu0 %v1188_v2  ;;  %951 = vmatprep.mubr.msk.f32.mxu0 %vm1186_vm0, %v1185_v0 }
 0x262   :  { %1043 = vmatprep.subr.bf16.mxu0 %v1187_v1 }
 0x265   :  { %1044 = vmatpush3.bf16.msra.mxu0 %v1188_v2 }
 0x266   :  { %1045 = vmatprep.subr.bf16.mxu0 %v1187_v1 }
 0x269   :  { %1046 = vmatpush3.bf16.msra.mxu0 %v1188_v2 }
 0x26a   :  { %1047 = vmatprep.subr.bf16.mxu0 %v1187_v1 }
 0x26d   :  { %1048 = vmatpush3.bf16.msra.mxu0 %v1188_v2 }
 0x26e   :  { %1049 = vmatprep.subr.bf16.mxu0 %v1187_v1 }
 0x271   :  { %1050 = vmatpush3.bf16.msra.mxu0 %v1188_v2 }
 0x272   :  { %1051 = vmatprep.subr.bf16.mxu0 %v1187_v1 }
 0x275   :  { %1052 = vmatpush3.bf16.msra.mxu0 %v1188_v2 }
 0x276   :  { %1053 = vmatprep.subr.bf16.mxu0 %v1187_v1 }
 0x279   :  { %1054 = vmatpush3.bf16.msra.mxu0 %v1188_v2 }
 0x27a   :  { %1055 = vmatprep.subr.bf16.mxu0 %v1187_v1 }
 0x27d   :  { %1056 = vmatpush3.bf16.msra.mxu0 %v1188_v2 }
 0x27e   :  { %989 = vmatprep.subr.bf16.mxu0 %v1185_v0 }
 0x333   :  { %v267_v25 = vpop.f32.mrb[0].mxu0 }
 0x334   :  { %v271_v26 = vmul.f32 0.0078125, %v267_v25  ;;  %v898_v27 = vpop.f32.mrb[1].mxu0 }
 0x336   :  { %v272_v28 = vadd.f32 1e-05, %v271_v26 }
 0x338   :  { %1103 = vrsqrt.f32 %v272_v28 }
 0x342   :  { %v1104_v30 = vpop.eup %1103 }
 0x343   :  { %276 = vperm.xlu0 %1083, %v1104_v30  }
 0x3c2   :  { %v277_v34 = vpop.permute.xlu0 %276 }
 0x3c3   :  { %v279_v35 = vmul.f32 %v277_v34, %v199_v18 }
 0x3c5   :  { %v284_v37 = vmul.f32 %v710_v33, %v279_v35 }
 0x3c7   :  { %v289_v38 = vadd.f32 %v711_v36, %v284_v37 }
 0x3c9   :  { %vm290_vm2 = vcmp.gt.f32.partialorder %v289_v38, 0.0  ;;  %v291_v39 = vmul.f32 0.01, %v289_v38 }
 0x3cb   :  { %v292_v40 = vsel %vm290_vm2, %v289_v38, %v291_v39 }
 0x3cc   :  { %v309_v41 = vpack.c.bf16 %v292_v40, %v292_v40 }
 0x3ce   :  { %916 = vmatmul.mubr.bf16.vlgmr.msra.gmra.mrb[8].mxu1 %v309_v41 }
 0x3cf   :  { %1058 = vmatpush3.bf16.msra.mxu1 %v1188_v2  ;;  %986 = vmatprep.mubr.msk.f32.mxu1 %vm1186_vm0, %v1185_v0 }
 0x3d0   :  { %1059 = vmatprep.subr.bf16.mxu1 %v1187_v1 }
 0x3d3   :  { %1060 = vmatpush3.bf16.msra.mxu1 %v1188_v2 }
 0x3d4   :  { %1061 = vmatprep.subr.bf16.mxu1 %v1187_v1 }
 0x3d7   :  { %1062 = vmatpush3.bf16.msra.mxu1 %v1188_v2 }
 0x3d8   :  { %1063 = vmatprep.subr.bf16.mxu1 %v1187_v1 }
 0x3db   :  { %1064 = vmatpush3.bf16.msra.mxu1 %v1188_v2 }
 0x3dc   :  { %1065 = vmatprep.subr.bf16.mxu1 %v1187_v1 }
 0x3df   :  { %1066 = vmatpush3.bf16.msra.mxu1 %v1188_v2 }
 0x3e0   :  { %1067 = vmatprep.subr.bf16.mxu1 %v1187_v1 }
 0x3e3   :  { %1068 = vmatpush3.bf16.msra.mxu1 %v1188_v2 }
 0x3e4   :  { %1069 = vmatprep.subr.bf16.mxu1 %v1187_v1 }
 0x3e7   :  { %1070 = vmatpush3.bf16.msra.mxu1 %v1188_v2 }
 0x3e8   :  { %1071 = vmatprep.subr.bf16.mxu1 %v1187_v1 }
 0x3eb   :  { %1072 = vmatpush3.bf16.msra.mxu1 %v1188_v2  ;;  %v1101_v2 = vld [vmem:[%s1431_s5 + $0x30] sm:$0xff]   ;;  %s1190_s5 = smov [#allocation7]  }
 0x3ec   :  { %s696_s15 = sshll.u32 %s1190_s5, 4  ;;  %s697_s15 = int_to_ptr.vmem [resolvable:$true] %s696_s15 }
 0x3ed   :  { %s1153_s16 = scalar_lea.vmem %s697_s15, 128  ;;  %p1158_p3 = scmp.lt.s32.totalorder %s697_s15, %s697_s15 }
 0x3ee   :  { %p1154_p2 = scmp.ne.s32.totalorder %s697_s15, %s1153_s16  ;;  %p1159_p4 = scmp.lt.s32.totalorder %s1153_s16, %s1153_s16 }
 0x3f0   :  { %p1160_p5 = por %p1159_p4, %p1158_p3 }
 0x3f2   :  { %p1161_p6 = pnand %p1160_p5, %p1154_p2 }
 0x4a1   :  { %v397_v43 = vpop.f32.mrb[8].mxu1 }
 0x4a2   :  { %v398_v44 = vadd.f32 %v712_v42, %v397_v43  ;;  %v917_v45 = vpop.f32.mrb[9].mxu1 }
 0x4a3   :  { %v400_v46 = vpop.f32.mrb[10].mxu1 }
 0x4a4   :  { %v918_v47 = vpop.f32.mrb[11].mxu1  ;;  %952 = vmatmul.mubr.f32.vlgmr.msra.gmra.mrb[2].mxu0 %v398_v44 }
 0x4a5   :  { %1005 = vmatprep.mubr.msk.bf16.mxu0 %vm1186_vm0, %v1185_v0  ;;  %990 = vmatpush3.bf16.msra.mxu0 %v1095_v54 }
 0x4a6   :  { %991 = vmatprep.subr.bf16.mxu0 %v1185_v0 }
 0x4a9   :  { %992 = vmatpush3.bf16.msra.mxu0 %v1096_v55 }
 0x4aa   :  { %993 = vmatprep.subr.bf16.mxu0 %v1185_v0 }
 0x4ad   :  { %994 = vmatpush3.bf16.msra.mxu0 %v1097_v56 }
 0x4ae   :  { %995 = vmatprep.subr.bf16.mxu0 %v1185_v0 }
 0x4b1   :  { %996 = vmatpush3.bf16.msra.mxu0 %v1098_v57 }
 0x4b2   :  { %997 = vmatprep.subr.bf16.mxu0 %v1185_v0 }
 0x4b5   :  { %998 = vmatpush3.bf16.msra.mxu0 %v1099_v58 }
 0x4b6   :  { %999 = vmatprep.subr.bf16.mxu0 %v1185_v0 }
 0x4b9   :  { %1000 = vmatpush3.bf16.msra.mxu0 %v1100_v63 }
 0x4ba   :  { %1001 = vmatprep.subr.bf16.mxu0 %v1185_v0 }
 0x4bd   :  { %1002 = vmatpush3.bf16.msra.mxu0 %v1101_v2 }
 0x4be   :  { %1003 = vmatprep.subr.bf16.mxu0 %v1185_v0  ;;  %v723_v0 = vld [vmem:[%s1432_s6] ss:$0 sm:$0xff] }
 0x4c1   :  { %1004 = vmatpush3.bf16.msra.mxu0 %v1102_v3 }
 0x577   :  { %v471_v48 = vpop.f32.mrb[2].mxu0 }
 0x578   :  { %v475_v49 = vmul.f32 0.0078125, %v471_v48  ;;  %v953_v50 = vpop.f32.mrb[3].mxu0 }
 0x57a   :  { %478 = vperm.xlu1 %1084, %v475_v49  }
 0x5f9   :  { %v479_v51 = vpop.permute.xlu1 %478 }
 0x5fa   :  { %v481_v52 = vsub.f32 %v398_v44, %v479_v51 }
 0x5fc   :  { %v482_v53 = vmul.f32 %v481_v52, %v481_v52 }
 0x5fe   :  { %987 = vmatmul.mubr.f32.vlgmr.msra.gmra.mrb[6].mxu1 %v482_v53 }
 0x6d1   :  { %v549_v59 = vpop.f32.mrb[6].mxu1 }
 0x6d2   :  { %v553_v60 = vmul.f32 0.0078125, %v549_v59  ;;  %v988_v61 = vpop.f32.mrb[7].mxu1 }
 0x6d4   :  { %v554_v62 = vadd.f32 1e-05, %v553_v60 }
 0x6d6   :  { %1105 = vrsqrt.f32 %v554_v62 }
 0x6e0   :  { %v1106_v1 = vpop.eup %1105 }
 0x6e1   :  { %558 = vperm.xlu1 %1084, %v1106_v1  }
 0x760   :  { %v559_v5 = vpop.permute.xlu1 %558 }
 0x761   :  { %v561_v6 = vmul.f32 %v559_v5, %v481_v52 }
 0x763   :  { %v566_v8 = vmul.f32 %v721_v4, %v561_v6 }
 0x765   :  { %v571_v9 = vadd.f32 %v722_v7, %v566_v8 }
 0x767   :  { %vm572_vm3 = vcmp.gt.f32.partialorder %v571_v9, 0.0  ;;  %v573_v10 = vmul.f32 0.01, %v571_v9 }
 0x769   :  { %v574_v11 = vsel %vm572_vm3, %v571_v9, %v573_v10 }
 0x76a   :  { %v591_v12 = vpack.c.bf16 %v574_v11, %v574_v11 }
 0x76c   :  { %1006 = vmatmul.mubr.bf16.vlgmr.msra.gmra.mrb[4].mxu0 %v591_v12 }
 0x83f   :  { %v681_v13 = vpop.f32.mrb[4].mxu0 }
 0x840   :  { %v682_v14 = vadd.f32 %v723_v0, %v681_v13  ;;  %v1007_v15 = vpop.f32.mrb[5].mxu0 }
 0x841   :  { %v684_v16 = vpop.f32.mrb[6].mxu0 }
 0x842   :  { %1107 = vtanh.f32 %v682_v14  ;;  %v1008_v17 = vpop.f32.mrb[7].mxu0 }
 0x84c   :  { %v1108_v18 = vpop.eup %1107 }
 0x84d   :  { %689 = vst.msk [vmem:[#allocation7] sm:$0xff] %vm688_vm4, %v1108_v18 }
 0x84e   :  { %1164 = shalt.err (!%p1161_p6)
}
 0x84f   :  { %s1165_s18 = scalar_lea.hbm %s1433_s7, 128 }
 0x850   :  { %p1166_p7 = scmp.ne.s32.totalorder %s1433_s7, %s1165_s18  ;;  %p1169_p8 = scmp.lt.u32.totalorder %s1165_s18, %s1433_s7 }
 0x852   :  { %p1171_p9 = pnand %p1169_p8, %p1166_p7 }
 0x854   :  { %1174 = shalt.err (!%p1171_p9)
}
 0x855   :  { %699 = dma.vmem_to_hbm [thread:$0]  %s697_s15, 128, %s1433_s7, [#allocation4]  }
 0x856   :  { %1179 = dma.done.wait [#allocation4], 128  }
 0x857   :  { %1180 = vsyncadd [#allocation4], 4294967168 }
 0x858   :  { %703 = vsyncpa [#allocation3], 1 }
 0x859   :  { %704 = vsyncpa [#allocation6], 1 }
 0x85a   :  { %705 = vsyncpa [#allocation4], 1 }

</bundles_post_ra>
